<compile_context>
chip_gen: v6e
topology: v6e:2x2x1
jax: 0.10.0
libtpu: 0.0.40
codegen_flags: <defaults>
</compile_context>

<pallas_src>
import jax
import jax.numpy as jnp
from jax.experimental import pallas as pl
from jax.experimental.pallas import tpu as pltpu


def _choose_tile_b(bsz, k, itemsize):
    """Batch-tile rows targeting ~2 MiB per input buffer (double-buffer safe on
    v7x's 64 MiB VMEM; large enough to amortize per-grid-step overhead on v5e/v6e)."""
    target_bytes = 2 * 1024 * 1024
    rows = target_bytes // max(1, k * itemsize)
    rows = (rows // 16) * 16          # multiple of 16 -> also satisfies bf16 (16,128) tiling
    if rows < 16:
        rows = 16
    if rows >= bsz:
        return bsz                    # single tile; block == full array dim is always legal
    return rows


def nce_softmax_loss_sam_threshold_new(x, threshold, *, tile_b=None):
    """x: (bsz, K) or (bsz, K, 1) logits (any float dtype). threshold: scalar.

    Returns (mean_loss_over_thresholded, count) as (f32[], i32[])."""
    # Mimic torch .squeeze(), but guarded so bsz==1 / K==1 doesn't collapse rank.
    if x.ndim == 3 and x.shape[-1] == 1:
        x = jnp.squeeze(x, axis=-1)
    elif x.ndim != 2:
        x = jnp.squeeze(x)
    bsz, k = x.shape

    if tile_b is None:
        tile_b = _choose_tile_b(bsz, k, x.dtype.itemsize)
    num_tiles = int(pl.cdiv(bsz, tile_b))

    thr_arr = jnp.asarray([threshold], dtype=jnp.float32)

    def kernel(thr_ref, x_ref, out_ref):
        i = pl.program_id(0)
        xt = x_ref[...].astype(jnp.float32)                    # widen in-vreg (bf16 stays bf16 in HBM)

        # Mask rows past the end of the batch (last partial tile may contain garbage).
        row = jax.lax.broadcasted_iota(jnp.int32, (tile_b, 1), 0)
        valid = (i * tile_b + row) < bsz                       # (tile_b, 1)

        # Cross-entropy with label 0: loss = logsumexp(x) - x[:, 0]  (max-stabilized, f32)
        m = jnp.max(xt, axis=-1, keepdims=True)                # (tile_b, 1)
        lse = m + jnp.log(jnp.sum(jnp.exp(xt - m), axis=-1, keepdims=True))
        loss = lse - xt[:, 0:1]                                # (tile_b, 1)

        thr = thr_ref[0]
        sel = (loss > thr) & valid
        count_f = jnp.sum(jnp.where(sel, 1.0, 0.0))            # exact for bsz < 2^24
        loss_sum = jnp.sum(jnp.where(sel, loss, 0.0))
        row0 = loss[0, 0]                                      # only tile 0's value is consumed

        # Per-tile partials packed into a (1, 8, 128) lane-dense block:
        #   [0,0,0]=loss_sum  [0,0,1]=count  [0,0,2]=loss of this tile's row 0
        lane = jax.lax.broadcasted_iota(jnp.int32, (1, 8, 128), 2)
        sub = jax.lax.broadcasted_iota(jnp.int32, (1, 8, 128), 1)
        first = sub == 0
        out_ref[...] = jnp.where(
            first & (lane == 0), loss_sum,
            jnp.where(first & (lane == 1), count_f,
                      jnp.where(first & (lane == 2), row0, 0.0)))

    cost = pl.CostEstimate(
        flops=6 * bsz * k,
        transcendentals=bsz * k + bsz,                         # exp per element + log per row
        bytes_accessed=bsz * k * x.dtype.itemsize + num_tiles * 8 * 128 * 4,
    )

    partials = pl.pallas_call(
        kernel,
        grid=(num_tiles,),
        in_specs=[
            pl.BlockSpec(memory_space=pltpu.SMEM),             # threshold scalar, SMEM-resident
            pl.BlockSpec((tile_b, k), lambda i: (i, 0)),       # batch tile of logits (auto-pipelined)
        ],
        out_specs=pl.BlockSpec((1, 8, 128), lambda i: (i, 0, 0)),
        out_shape=jax.ShapeDtypeStruct((num_tiles, 8, 128), jnp.float32),
        compiler_params=pltpu.CompilerParams(
            dimension_semantics=("parallel",),                 # independent tiles -> megacore on v7x
            vmem_limit_bytes=32 * 1024 * 1024,
        ),
        cost_estimate=cost,
    )(thr_arr, x)

    # Tiny final reduce + count==0 fallback in plain JAX.
    loss_sums = partials[:, 0, 0]
    counts = partials[:, 0, 1]
    row0_loss = partials[0, 0, 2]                              # loss of global row 0

    count = jnp.sum(counts).astype(jnp.int32)
    total = jnp.sum(loss_sums)
    count_final = jnp.where(count == 0, jnp.int32(1), count)
    loss_t = jnp.where(count == 0, row0_loss, total)
    return loss_t / count_final.astype(jnp.float32), count_final


def _reference(x, threshold):
    # Pure-JAX reference for a sanity check.
    if x.ndim == 3 and x.shape[-1] == 1:
        x = jnp.squeeze(x, axis=-1)
    elif x.ndim != 2:
        x = jnp.squeeze(x)
    xf = x.astype(jnp.float32)
    loss = jax.nn.logsumexp(xf, axis=-1) - xf[:, 0]
    mask = loss > threshold
    count = jnp.sum(mask.astype(jnp.int32))
    loss_sum = jnp.sum(jnp.where(mask, loss, 0.0))
    count_f = jnp.where(count == 0, jnp.int32(1), count)
    loss_t = jnp.where(count == 0, loss[0], loss_sum)
    return loss_t / count_f.astype(jnp.float32), count_f


if __name__ == "__main__":
    key = jax.random.PRNGKey(0)
    bsz, k = 20, 256
    # Usual NCE input shape (bsz, 1 + num_negatives, 1) before squeeze.
    x = jax.random.normal(key, (bsz, k, 1), dtype=jnp.float32)

    # Threshold near log(K) so some rows pass and some don't; tile_b=8 forces the
    # tiled + remainder-masked path (grid of 3 tiles, last tile only 4 valid rows).
    threshold = 5.5
    loss_mean, count = nce_softmax_loss_sam_threshold_new(x, threshold, tile_b=8)
    jax.block_until_ready((loss_mean, count))

    ref_loss, ref_count = _reference(x, threshold)
    assert int(count) == int(ref_count), (int(count), int(ref_count))
    assert abs(float(loss_mean) - float(ref_loss)) < 1e-4, (float(loss_mean), float(ref_loss))

    # count == 0 fallback path: loss_t = loss[0], count = 1.
    loss_mean2, count2 = nce_softmax_loss_sam_threshold_new(x, 1e6, tile_b=8)
    jax.block_until_ready((loss_mean2, count2))
    ref_loss2, ref_count2 = _reference(x, 1e6)
    assert int(count2) == 1 and int(ref_count2) == 1, (int(count2), int(ref_count2))
    assert abs(float(loss_mean2) - float(ref_loss2)) < 1e-4, (float(loss_mean2), float(ref_loss2))

    print("KERNEL_OK")
</pallas_src>

<mosaic_0001>
module attributes {stable_mosaic.version = 11 : i64} {
  func.func @kernel(%arg0: i32, %arg1: memref<1xf32, #tpu.memory_space<smem>>, %arg2: memref<8x256xf32, #tpu.memory_space<vmem>>, %arg3: memref<1x8x128xf32, #tpu.memory_space<vmem>>) attributes {dimension_semantics = [#tpu.dimension_semantics<parallel>], iteration_bounds = array<i64: 3>, scalar_prefetch = 0 : i64, scratch_operands = 0 : i64, tpu.core_type = #tpu.core_type<tc>, window_params = [{transform_indices = @transform_0, window_bounds = array<i64: 1>}, {transform_indices = @transform_1, window_bounds = array<i64: 8, 256>}, {transform_indices = @transform_2, window_bounds = array<i64: 1, 8, 128>}]} {
    %c0 = arith.constant 0 : index
    %c0_0 = arith.constant 0 : index
    %0 = vector.load %arg2[%c0, %c0_0] : memref<8x256xf32, #tpu.memory_space<vmem>>, vector<8x256xf32>
    %1 = tpu.iota {dimensions = array<i32: 0>} : vector<8x1xi32>
    %c8_i32 = arith.constant 8 : i32
    %2 = arith.muli %arg0, %c8_i32 : i32
    %3 = vector.broadcast %2 : i32 to vector<8x1xi32>
    %4 = arith.addi %3, %1 : vector<8x1xi32>
    %c20_i32 = arith.constant 20 : i32
    %5 = vector.broadcast %c20_i32 : i32 to vector<8x1xi32>
    %6 = arith.cmpi slt, %4, %5 : vector<8x1xi32>
    %cst = arith.constant dense<0xFF800000> : vector<8xf32>
    %7 = vector.multi_reduction <maximumf>, %0, %cst [1] : vector<8x256xf32> to vector<8xf32>
    %8 = vector.shape_cast %7 : vector<8xf32> to vector<8x1xf32>
    %9 = vector.broadcast %8 : vector<8x1xf32> to vector<8x256xf32>
    %10 = arith.subf %0, %9 : vector<8x256xf32>
    %11 = math.exp %10 : vector<8x256xf32>
    %cst_1 = arith.constant dense<0.000000e+00> : vector<8xf32>
    %12 = vector.multi_reduction <add>, %11, %cst_1 [1] : vector<8x256xf32> to vector<8xf32>
    %13 = vector.shape_cast %12 : vector<8xf32> to vector<8x1xf32>
    %14 = math.log %13 : vector<8x1xf32>
    %15 = arith.addf %8, %14 : vector<8x1xf32>
    %16 = vector.extract_strided_slice %0 {offsets = [0, 0], sizes = [8, 1], strides = [1, 1]} : vector<8x256xf32> to vector<8x1xf32>
    %17 = arith.subf %15, %16 : vector<8x1xf32>
    %c0_2 = arith.constant 0 : index
    %18 = memref.load %arg1[%c0_2] : memref<1xf32, #tpu.memory_space<smem>>
    %19 = vector.broadcast %18 : f32 to vector<8x1xf32>
    %20 = arith.cmpf ogt, %17, %19 : vector<8x1xf32>
    %21 = arith.andi %20, %6 : vector<8x1xi1>
    %cst_3 = arith.constant 1.000000e+00 : f32
    %cst_4 = arith.constant 0.000000e+00 : f32
    %22 = vector.broadcast %cst_3 : f32 to vector<8x1xf32>
    %23 = vector.broadcast %cst_4 : f32 to vector<8x1xf32>
    %24 = arith.select %21, %22, %23 : vector<8x1xi1>, vector<8x1xf32>
    %25 = vector.shape_cast %24 : vector<8x1xf32> to vector<1x8x1xf32>
    %cst_5 = arith.constant dense<0.000000e+00> : vector<1xf32>
    %26 = vector.multi_reduction <add>, %25, %cst_5 [1, 2] : vector<1x8x1xf32> to vector<1xf32>
    %27 = vector.shape_cast %26 : vector<1xf32> to vector<1x1x1xf32>
    %28 = vector.extract %27[0, 0, 0] : f32 from vector<1x1x1xf32>
    %cst_6 = arith.constant 0.000000e+00 : f32
    %29 = vector.broadcast %cst_6 : f32 to vector<8x1xf32>
    %30 = arith.select %21, %17, %29 : vector<8x1xi1>, vector<8x1xf32>
    %31 = vector.shape_cast %30 : vector<8x1xf32> to vector<1x8x1xf32>
    %cst_7 = arith.constant dense<0.000000e+00> : vector<1xf32>
    %32 = vector.multi_reduction <add>, %31, %cst_7 [1, 2] : vector<1x8x1xf32> to vector<1xf32>
    %33 = vector.shape_cast %32 : vector<1xf32> to vector<1x1x1xf32>
    %34 = vector.extract %33[0, 0, 0] : f32 from vector<1x1x1xf32>
    %35 = vector.extract_strided_slice %17 {offsets = [0, 0], sizes = [1, 1], strides = [1, 1]} : vector<8x1xf32> to vector<1x1xf32>
    %36 = vector.extract %35[0, 0] : f32 from vector<1x1xf32>
    %37 = tpu.iota {dimensions = array<i32: 2>} : vector<1x8x128xi32>
    %38 = tpu.iota {dimensions = array<i32: 1>} : vector<1x8x128xi32>
    %c0_i32 = arith.constant 0 : i32
    %39 = vector.broadcast %c0_i32 : i32 to vector<1x8x128xi32>
    %40 = arith.cmpi eq, %38, %39 : vector<1x8x128xi32>
    %c0_i32_8 = arith.constant 0 : i32
    %41 = vector.broadcast %c0_i32_8 : i32 to vector<1x8x128xi32>
    %42 = arith.cmpi eq, %37, %41 : vector<1x8x128xi32>
    %43 = arith.andi %40, %42 : vector<1x8x128xi1>
    %c1_i32 = arith.constant 1 : i32
    %44 = vector.broadcast %c1_i32 : i32 to vector<1x8x128xi32>
    %45 = arith.cmpi eq, %37, %44 : vector<1x8x128xi32>
    %46 = arith.andi %40, %45 : vector<1x8x128xi1>
    %c2_i32 = arith.constant 2 : i32
    %47 = vector.broadcast %c2_i32 : i32 to vector<1x8x128xi32>
    %48 = arith.cmpi eq, %37, %47 : vector<1x8x128xi32>
    %49 = arith.andi %40, %48 : vector<1x8x128xi1>
    %cst_9 = arith.constant 0.000000e+00 : f32
    %50 = vector.broadcast %36 : f32 to vector<1x8x128xf32>
    %51 = vector.broadcast %cst_9 : f32 to vector<1x8x128xf32>
    %52 = arith.select %49, %50, %51 : vector<1x8x128xi1>, vector<1x8x128xf32>
    %53 = vector.broadcast %28 : f32 to vector<1x8x128xf32>
    %54 = arith.select %46, %53, %52 : vector<1x8x128xi1>, vector<1x8x128xf32>
    %55 = vector.broadcast %34 : f32 to vector<1x8x128xf32>
    %56 = arith.select %43, %55, %54 : vector<1x8x128xi1>, vector<1x8x128xf32>
    %c0_10 = arith.constant 0 : index
    %c0_11 = arith.constant 0 : index
    %c0_12 = arith.constant 0 : index
    %57 = vector.load %arg3[%c0_10, %c0_11, %c0_12] : memref<1x8x128xf32, #tpu.memory_space<vmem>>, vector<1x8x128xf32>
    tpu.vector_store %arg3[%c0_10, %c0_11, %c0_12], %56 {strides = array<i32>} : memref<1x8x128xf32, #tpu.memory_space<vmem>>, vector<1x8x128xf32>,
    return
  }
  func.func @transform_0(%arg0: i32) -> i32 {
    %c0_i32 = arith.constant 0 : i32
    %c0_i32_0 = arith.constant 0 : i32
    return %c0_i32 : i32
  }
  func.func @transform_1(%arg0: i32) -> (i32, i32) {
    %c0_i32 = arith.constant 0 : i32
    %c0_i32_0 = arith.constant 0 : i32
    return %arg0, %c0_i32 : i32, i32
  }
  func.func @transform_2(%arg0: i32) -> (i32, i32, i32) {
    %c0_i32 = arith.constant 0 : i32
    %c0_i32_0 = arith.constant 0 : i32
    %c0_i32_1 = arith.constant 0 : i32
    return %arg0, %c0_i32, %c0_i32_0 : i32, i32, i32
  }
}

</mosaic_0001>

<bundles_post_ra>
// kernel: tpu_custom_call.1
= control target key start
LH: loop header
LB: loop body
LE: loop exit
PB: predicated region body
PF: predicated region fallthrough
CT: control target
= control target key end

     0   :  { %s649_s0 = inlined_call_operand.<no memory space> [shape: f32[1], index: 0, kind: input, shape index: {}]   ;;  %s650_s1 = inlined_call_operand.hbm [shape: f32[20,256], index: 1, kind: input, shape index: {}]   ;;  %s651_s2 = inlined_call_operand.hbm [shape: f32[3,8,128], index: 2, kind: output, shape index: {}]  }
   0x1   :  { %7 = sst [smem:[#allocation2]] %s649_s0 }
   0x2   :  { %8 = vsyncpa [#allocation4], 0 }
   0x3   :  { %10 = vsyncpa [#allocation4 + $0x1], 0 }
   0x4   :  { %11 = vsyncpa [#allocation5], 0 }
   0x5   :  { %13 = vsyncpa [#allocation5 + $0x1], 0  ;;  %s502_s11 = smov 0   ;;  %s504_s12 = smov 0  }
   0x6   :  { %s506_s13 = smov 0   ;;  %s508_s14 = smov 0  }
   0x7 LB: > { %s523_s0 = sadd.s32 4294967295, %s479_s14   ;;  %s313_s15 = sadd.s32 4294967294, %s479_s14   ;;  %s479_s14 = sphi %s508_s14, %s667_s14   ;;  %s475_s13 = sphi %s506_s13, %s666_s13   ;;  %s471_s12 = sphi %s504_s12, %s665_s12   ;;  %s467_s11 = sphi %s502_s11, %s664_s11  }
   0x8   : > { %s527_s16 = sadd.s32 1, %s479_s14   ;;  %s47_s17 = sadd.s32 1, %s475_s13 }
   0x9   : > { %s44_s18 = ssub.s32 %s479_s14, %s527_s16  ;;  %p54_p0 = scmp.ne.s32.totalorder %s475_s13, %s471_s12 }
   0xa   : > { %p45_p1 = scmp.eq.s32.totalorder %s44_s18, 0  ;;  %p55_p2 = scmp.eq.s32.totalorder %s479_s14, 0 }
   0xb   : > { %p60_p3 = scmp.ne.s32.totalorder %s471_s12, %s467_s11  ;;  %p61_p4 = scmp.eq.s32.totalorder %s523_s0, 0 }
   0xc   : > { %s539_s19 = scalar_select %p45_p1, %s475_s13, %s47_s17  }
   0xd   : > { %p541_p5 = por %p55_p2, %p54_p0  ;;  %p545_p6 = por %p61_p4, %p60_p3 }
   0xe   : > { %p84_p7 = scmp.eq.s32.totalorder %s523_s0, 2  ;;  %p90_p8 = scmp.eq.s32.totalorder %s313_s15, 2 }
   0xf   : > { %s655_s21 = scalar_select %p545_p6, 1, 0 }
  0x10   : > { %p346_p9 = scmp.lt.s32.totalorder %s479_s14, 3  ;;  %p551_p10 = por %p84_p7, %p54_p0 }
  0x11   : > { %p555_p11 = por %p90_p8, %p60_p3  ;;  %s113_s24 = sand.u32 1, %s475_s13  }
  0x12   : > { %s656_s22 = scalar_select %p551_p10, 1, 0 }
  0x13   : > { %s657_s23 = scalar_select %p555_p11, 1, 0 }
  0x14   : > { %s327_s25 = sshll.u32 %s479_s14, 8  ;;  %s316_s26 = sshll.u32 %s113_s24, 4 }
  0x15   : > { %s564_s29 = scalar_lea.hbm %s650_s1, %s327_s25  ;;  %s117_s30 = scalar_lea.vmem [#allocation3], %s316_s26 }
  0x16   : > { %s125_s3 = sshll.u32 %s117_s30, 4  ;;  %p568_p12 = pnand %p346_p9, %p541_p5  ;;  %s572_s3 = int_to_ptr.vmem [resolvable:$true] %s125_s3 }
  0x17   : > { %s114_s5 = scalar_lea.sflag [#allocation4], %s113_s24  ;;  %s387_s6 = scalar_lea.hbm %s564_s29, 256 }
  0x18   : > { %p388_p1 = scmp.ne.s32.totalorder %s564_s29, %s387_s6  ;;  %p389_p2 = pneg %p568_p12 }
  0x19   : > { %s392_s9 = scalar_lea.hbm %s650_s1, 768  ;;  %p393_p5 = scmp.lt.s32.totalorder %s564_s29, %s650_s1 }
  0x1a   : > { %p390_p3 = pnand %p389_p2, %p388_p1  ;;  %p394_p7 = scmp.lt.s32.totalorder %s392_s9, %s387_s6 }
  0x1c   : > { %p391_p4 = pneg %p390_p3  ;;  %p395_p8 = por %p394_p7, %p393_p5 }
  0x1e   : > { %p396_p9 = pnand %p395_p8, %p391_p4 }
  0x20   : > { %399 = shalt.err (!%p396_p9)
}
  0x21   : > { %s400_s17 = scalar_lea.vmem %s572_s3, 256  ;;  %s481_s18 = smov [#allocation3]  }
  0x22   : > { %p401_p13 = scmp.ne.s32.totalorder %s572_s3, %s400_s17  ;;  %s405_s20 = sshll.u32 %s481_s18, 4  ;;  %s406_s20 = int_to_ptr.vmem [resolvable:$false] %s405_s20 }
  0x23   : > { %s407_s24 = scalar_lea.vmem %s406_s20, 512  ;;  %p408_p3 = scmp.lt.s32.totalorder %s572_s3, %s406_s20 }
  0x24   : > { %p403_p0 = pnand %p401_p13, %p389_p2  ;;  %p409_p11 = scmp.lt.s32.totalorder %s407_s24, %s400_s17 }
  0x26   : > { %p404_p1 = pneg %p403_p0  ;;  %p410_p10 = por %p409_p11, %p408_p3 }
  0x28   : > { %p411_p6 = pnand %p410_p10, %p404_p1 }
  0x2a   : > { %414 = shalt.err (!%p411_p6)
}
  0x2b   : > { %341 = dma.hbm_to_vmem [thread:$0]  (!%p568_p12), %s564_s29, 256, %s572_s3, %s114_s5  }
  0x2c   : > { %p659_p4 = scmp.lt.s32.totalorder %s479_s14, 4  ;;  %p660_p5 = scmp.ge.s32.totalorder %s479_s14, 1 }
  0x2e   : > { %p131_p13 = pnand %p660_p5, %p659_p4 }
  0x2f   : > { %s599_s25 = sand.u32 (!%p131_p13), 1, %s471_s12   ;;  %p661_p6 = scmp.ne.s32.totalorder (!%p131_p13), %s655_s21, 0 }
  0x30   : > { %134 = sbr.rel (%p131_p13) target bundleno = 600 (0x258), region = 28  ;;  %s320_s26 = sshll.u32 (!%p131_p13), %s599_s25, 4 }
  0x31   : > { %s137_s27 = scalar_lea.sflag (!%p131_p13), [#allocation4], %s599_s25  ;;  %s140_s28 = scalar_lea.vmem (!%p131_p13), [#allocation3], %s320_s26 }
  0x35   : > { %458 = dma.done.wait (%p661_p6), %s137_s27, 256  }
  0x36   : > { %460 = vsyncadd (%p661_p6), %s137_s27, 4294967040  ;;  %v161_v0 = vld [vmem:[%s140_s28] sm:$0xff]  ;;  %v162_v1 = vld [vmem:[%s140_s28 + $0x8] sm:$0xff]  ;;  %v163_v12 = vlaneseq  ;;  %s322_s21 = sshll.u32 %s523_s0, 3  ;;  %s185_s29 = sld [smem:[#allocation2]]  ;;  %vm190_vm2 = vcmask 7168  }
  0x37   : > { %v169_v2 = vmax.f32 %v161_v0, %v162_v1  ;;  %v166_v14 = vstv %s322_s21  ;;  %v482_v21 = vmov 0.0   ;;  %s321_s30 = sshll.u32 %s599_s25, 3  ;;  %s324_s5 = sshll.u32 %s523_s0, 7 }
  0x38   : > { %v164_v13 = vshrl.u32 %v163_v12, 7  ;;  %v214_v40 = vand.u32 127, %v163_v12  ;;  %s160_s7 = scalar_lea.vmem [#allocation6], %s321_s30  ;;  %s613_s15 = scalar_lea.hbm %s651_s2, %s324_s5 }
  0x39   : > { %170 = vmax.xlane.f32.xlu0 %v169_v2  ;;  %s243_s8 = sshll.u32 %s160_s7, 4  ;;  %s230_s0 = scalar_lea.sflag [#allocation5], %s599_s25  ;;  %s244_s8 = int_to_ptr.vmem [resolvable:$true] %s243_s8 }
  0x3a   : > { %v167_v17 = vadd.s32 %v166_v14, %v164_v13  ;;  %vm215_vm4 = vcmp.eq.s32.totalorder %v164_v13, 0  ;;  %vm220_vm5 = vcmp.eq.s32.totalorder %v214_v40, 2  ;;  %vm218_vm6 = vcmp.eq.s32.totalorder %v214_v40, 1  ;;  %s415_s17 = scalar_lea.vmem %s244_s8, 128  ;;  %p662_p11 = scmp.ne.s32.totalorder %s656_s22, 0 }
  0x3b   : > { %vm216_vm7 = vcmp.eq.s32.totalorder %v214_v40, 0  ;;  %vm221_vm8 = vmand %vm215_vm4, %vm220_vm5  ;;  %p416_p10 = scmp.ne.s32.totalorder %s244_s8, %s415_s17  ;;  %s483_s18 = smov [#allocation6]  }
  0x3c   : > { %v186_v19 = vstv %s185_s29  ;;  %vm168_vm0 = vcmp.lt.s32.totalorder %v167_v17, 20  ;;  %vm219_vm9 = vmand %vm215_vm4, %vm218_vm6  ;;  %s419_s20 = sshll.u32 %s483_s18, 4  ;;  %s420_s20 = int_to_ptr.vmem [resolvable:$false] %s419_s20 }
  0x3d   : > { %vm217_vm10 = vmand %vm215_vm4, %vm216_vm7  ;;  %p417_p12 = pnand %p416_p10, %p662_p11  ;;  %s421_s24 = scalar_lea.vmem %s420_s20, 256 }
  0x3e   : > { %p422_p2 = scmp.lt.s32.totalorder %s244_s8, %s420_s20  ;;  %p423_p7 = scmp.lt.s32.totalorder %s421_s24, %s415_s17 }
  0x3f   : > { %p418_p0 = pneg %p417_p12 }
  0x40   : > { %p424_p8 = por %p423_p7, %p422_p2 }
  0x42   : > { %p425_p9 = pnand %p424_p8, %p418_p0 }
  0xc2   : > { %v171_v3 = vpop.xlane.xlu0 %170 }
  0xc3   : > { %v172_v4 = vsub.f32 %v161_v0, %v171_v3  ;;  %v173_v5 = vsub.f32 %v162_v1, %v171_v3 }
  0xc5   : > { %v174_v6 = vmul.f32 1.442695, %v172_v4  ;;  %v176_v7 = vmul.f32 1.442695, %v173_v5 }
  0xc7   : > { %381 = vpow2.f32 %v174_v6 }
  0xc8   : > { %383 = vpow2.f32 %v176_v7 }
  0xd4   : > { %v382_v8 = vpop.eup %381 }
  0xd5   : > { %v384_v9 = vpop.eup %383 }
  0xd6   : > { %v178_v10 = vadd.f32 %v384_v9, %v382_v8 }
  0xd8   : > { %179 = vadd.xlane.f32.xlu0 %v178_v10 }
 0x161   : > { %v180_v11 = vpop.xlane.xlu0 %179 }
 0x162   : > { %385 = vlog2.f32 %v180_v11 }
 0x16f   : > { %v386_v15 = vpop.eup %385 }
 0x170   : > { %v182_v16 = vmul.f32 0.6931472, %v386_v15 }
 0x172   : > { %v183_v18 = vadd.f32 %v182_v16, %v171_v3 }
 0x174   : > { %v184_v20 = vsub.f32 %v183_v18, %v161_v0 }
 0x176   : > { %vm187_vm1 = vcmp.gt.f32.partialorder %v184_v20, %v186_v19 }
 0x177   : > { %vm188_vm3 = vmand %vm187_vm1, %vm168_vm0 }
 0x178   : > { %v189_v22 = vsel %vm188_vm3, 1.0, %v482_v21  ;;  %v201_v24 = vsel %vm188_vm3, %v184_v20, 0.0 }
 0x179   : > { %v191_v23 = vsel %vm190_vm2, %v189_v22, 0.0  ;;  %v202_v25 = vsel %vm190_vm2, %v201_v24, 0.0 }
 0x17a   : > { %192 = vadd.xlane.f32.xlu1 %v191_v23 }
 0x17e   : > { %203 = vadd.xlane.f32.xlu1 %v202_v25 }
 0x203   : > { %v193_v26 = vpop.xlane.xlu1 %192 }
 0x204   : > { %v194_v27 = vrot.slane %v193_v26, 4 }
 0x206   : > { %v195_v28 = vadd.f32 %v194_v27, %v193_v26 }
 0x207   : > { %v204_v29 = vpop.xlane.xlu1 %203 }
 0x208   : > { %v196_v30 = vrot.slane %v195_v28, 2  ;;  %v205_v31 = vrot.slane %v204_v29, 4 }
 0x20a   : > { %v206_v32 = vadd.f32 %v205_v31, %v204_v29  ;;  %v197_v33 = vadd.f32 %v196_v30, %v195_v28 }
 0x20c   : > { %v207_v34 = vrot.slane %v206_v32, 2  ;;  %v198_v35 = vrot.slane %v197_v33, 1 }
 0x20e   : > { %v208_v36 = vadd.f32 %v207_v34, %v206_v32  ;;  %v199_v37 = vadd.f32 %v198_v35, %v197_v33 }
 0x210   : > { %328 = vpush %v199_v37  ;;  %v209_v38 = vrot.slane %v208_v36, 1 }
 0x212   : > { %v210_v39 = vadd.f32 %v209_v38, %v208_v36 }
 0x214   : > { %330 = vpush %v210_v39 }
 0x215   : > { %332 = vpush %v184_v20 }
 0x241   : > { %s329_s3 = spop %328 }
 0x242   : > { %v224_v42 = vstv %s329_s3 }
 0x245   : > { %s331_s4 = spop %330 }
 0x246   : > { %s333_s6 = spop %332  ;;  %v226_v44 = vstv %s331_s4 }
 0x247   : > { %v222_v41 = vstv %s333_s6 }
 0x248   : > { %v223_v43 = vsel %vm221_vm8, %v222_v41, 0.0 }
 0x249   : > { %v225_v45 = vsel %vm219_vm9, %v224_v42, %v223_v43 }
 0x24a   : > { %v227_v46 = vsel %vm217_vm10, %v226_v44, %v225_v45 }
 0x24b   : > { %228 = vst [vmem:[%s160_s7] sm:$0xff] %v227_v46 }
 0x24c   : > { %428 = shalt.err (!%p425_p9)
}
 0x24d   : > { %s429_s26 = scalar_lea.hbm %s613_s15, 128  ;;  %s433_s28 = scalar_lea.hbm %s651_s2, 384 }
 0x24e   : > { %p430_p1 = scmp.ne.s32.totalorder %s613_s15, %s429_s26  ;;  %p434_p5 = scmp.lt.s32.totalorder %s613_s15, %s651_s2 }
 0x24f   : > { %p435_p13 = scmp.lt.s32.totalorder %s433_s28, %s429_s26 }
 0x250   : > { %p431_p3 = pnand %p430_p1, %p662_p11 }
 0x251   : > { %p436_p6 = por %p435_p13, %p434_p5 }
 0x252   : > { %p432_p4 = pneg %p431_p3 }
 0x254   : > { %p437_p10 = pnand %p436_p6, %p432_p4 }
 0x256   : > { %440 = shalt.err (!%p437_p10)
}
 0x257   : > { %336 = dma.vmem_to_hbm [thread:$0]  (%p662_p11), %s244_s8, 128, %s613_s15, %s230_s0  }
 0x258 PF: > { %p347_p12 = scmp.ge.s32.totalorder %s479_s14, 2  ;;  %s255_s30 = sand.u32 1, %s467_s11  }
 0x259   : > { %p663_p0 = scmp.ne.s32.totalorder %s657_s23, 0  ;;  %s256_s3 = scalar_lea.sflag [#allocation5], %s255_s30 }
 0x25b   : > { %p343_p2 = pnand %p347_p12, %p663_p0 }
 0x25d   : > { %p344_p7 = pneg %p343_p2 }
 0x25f   : > { %462 = dma.done.wait (%p344_p7), %s256_s3, 128  }
 0x260   : > { %464 = vsyncadd (%p344_p7), %s256_s3, 4294967168  ;;  %p16_p8 = scmp.ge.s32.totalorder %s527_s16, 5   ;;  %s664_s11 = smov %s471_s12 }
 0x261   : > { %s665_s12 = smov %s475_s13  ;;  %s666_s13 = smov %s539_s19 }
 0x262   : > { %s667_s14 = smov %s527_s16  ;;  %18 = sbr.rel (!%p16_p8) target bundleno = 7 (0x7), region = 73 }
 0x267   :  { %261 = vsyncpa [#allocation4], 1 }
 0x268   :  { %263 = vsyncpa [#allocation4 + $0x1], 1 }
 0x269   :  { %264 = vsyncpa [#allocation5], 1 }
 0x26a   :  { %266 = vsyncpa [#allocation5 + $0x1], 1 }

</bundles_post_ra>
